<compile_context>
chip_gen: v5e
topology: v5e:2x2
jax: 0.10.0
libtpu: 0.0.40
codegen_flags: <defaults>
</compile_context>

<pallas_src>
import functools

import numpy as np
import jax
import jax.numpy as jnp
from jax import lax
from jax.experimental import pallas as pl
from jax.experimental.pallas import tpu as pltpu


# ----------------------------- schedule construction (plain numpy glue) -----

def clip_noise_schedule(alphas2, clip_value=0.001):
    alphas2 = np.concatenate([np.ones(1), alphas2], axis=0)
    alphas_step = alphas2[1:] / alphas2[:-1]
    alphas_step = np.clip(alphas_step, a_min=clip_value, a_max=1.0)
    alphas2 = np.cumprod(alphas_step, axis=0)
    return alphas2


def polynomial_schedule(timesteps: int, s=0.0001, power=3.0):
    steps = timesteps + 1
    x = np.linspace(0, steps, steps)
    alphas2 = (1 - np.power(x / steps, power)) ** 2
    alphas2 = clip_noise_schedule(alphas2, clip_value=0.001)
    precision = 1 - 2 * s
    alphas2 = precision * alphas2 + s
    return alphas2


def make_gamma_table(noise_schedule: str, timesteps: int, precision: float) -> np.ndarray:
    splits = noise_schedule.split('_')
    assert len(splits) == 2
    power = float(splits[1])
    alphas2 = polynomial_schedule(timesteps, s=precision, power=power)
    sigmas2 = 1 - alphas2
    log_alphas2 = np.log(alphas2)
    log_sigmas2 = np.log(sigmas2)
    log_alphas2_to_sigmas2 = log_alphas2 - log_sigmas2
    gamma = (-log_alphas2_to_sigmas2).astype(np.float32)   # shape (timesteps + 1,)
    return gamma


# ----------------------------- Pallas kernel --------------------------------

def _gamma_gather_kernel(t_int_ref, gamma_ref, o_ref, *, unroll):
    # t_int_ref: (B,)   int32  SMEM — precomputed, clamped timestep indices.
    # gamma_ref: (T+1,) f32    SMEM — noise-schedule table.
    # o_ref:     (B,)   f32    SMEM — gathered gamma values.
    B = t_int_ref.shape[0]

    def body(i, carry):
        o_ref[i] = gamma_ref[t_int_ref[i]]   # scalar gather on the scalar unit
        return carry

    lax.fori_loop(0, B, body, 0, unroll=unroll)


class PredefinedNoiseSchedulePallas:
    """JAX/Pallas port of PredefinedNoiseSchedule (non-learned gamma lookup)."""

    def __init__(self, noise_schedule: str, timesteps: int, precision: float):
        self.timesteps = timesteps
        gamma_np = make_gamma_table(noise_schedule, timesteps, precision)  # (T+1,)
        # Keep the table 1-D: SMEM pads a 1-D f32[N] to next_pow2(4N) bytes
        # (~4 KiB for T=1000) instead of the 14x blowup a 2-D layout would get.
        self.gamma = jnp.asarray(gamma_np)                                 # (T+1,) f32

    def __call__(self, t: jax.Array) -> jax.Array:
        # t: (B, 1) float32 with values in [0, 1]; returns gamma[round(t * T)], shape (B, 1).
        assert t.ndim == 2 and t.shape[1] == 1
        B = t.shape[0]
        T = self.timesteps

        # round + clamp: trivial elementwise work, fused by XLA into the feed of the
        # kernel.  Clamping makes out-of-range t behave like a table clamp instead of
        # silently returning garbage / zero.
        t_int = jnp.clip(jnp.round(t.astype(jnp.float32) * float(T)), 0, T)
        t_int = t_int.astype(jnp.int32).reshape(B)

        kernel = functools.partial(_gamma_gather_kernel, unroll=(B <= 64))

        out = pl.pallas_call(
            kernel,
            out_shape=jax.ShapeDtypeStruct((B,), jnp.float32),
            in_specs=[
                pl.BlockSpec(memory_space=pltpu.MemorySpace.SMEM),   # t_int
                pl.BlockSpec(memory_space=pltpu.MemorySpace.SMEM),   # gamma table
            ],
            out_specs=pl.BlockSpec(memory_space=pltpu.MemorySpace.SMEM),
        )(t_int, self.gamma)

        return out.reshape(B, 1)


# ----------------------------- demo / check ----------------------------------

if __name__ == "__main__":
    timesteps = 1000
    precision = 1e-4
    sched = PredefinedNoiseSchedulePallas("polynomial_2", timesteps, precision)

    key = jax.random.PRNGKey(0)
    B = 8
    t = jax.random.uniform(key, (B, 1), dtype=jnp.float32)   # t in [0, 1)

    out = jax.block_until_ready(sched(t))

    # Reference (pure numpy, mirrors the PyTorch forward).
    gamma_np = make_gamma_table("polynomial_2", timesteps, precision)
    t_np = np.asarray(t)
    t_int = np.round(t_np * timesteps).astype(np.int64)
    ref = gamma_np[t_int[:, 0]].reshape(B, 1)

    np.testing.assert_allclose(np.asarray(out), ref, rtol=1e-6, atol=1e-6)
    print("KERNEL_OK")
</pallas_src>

<mosaic_0001>
module attributes {stable_mosaic.version = 11 : i64} {
  func.func @_gamma_gather_kernel(%arg0: memref<8xi32, #tpu.memory_space<smem>>, %arg1: memref<1001xf32, #tpu.memory_space<smem>>, %arg2: memref<8xf32, #tpu.memory_space<smem>>) attributes {dimension_semantics = [], scalar_prefetch = 0 : i64, scratch_operands = 0 : i64, tpu.core_type = #tpu.core_type<tc>} {
    %c0_i32 = arith.constant 0 : i32
    %0 = arith.index_cast %c0_i32 : i32 to index
    %1 = memref.load %arg0[%0] : memref<8xi32, #tpu.memory_space<smem>>
    %2 = arith.index_cast %1 : i32 to index
    %3 = memref.load %arg1[%2] : memref<1001xf32, #tpu.memory_space<smem>>
    %4 = arith.index_cast %c0_i32 : i32 to index
    %5 = memref.load %arg2[%4] : memref<8xf32, #tpu.memory_space<smem>>
    memref.store %3, %arg2[%4] : memref<8xf32, #tpu.memory_space<smem>>
    %c1_i32 = arith.constant 1 : i32
    %6 = arith.index_cast %c1_i32 : i32 to index
    %7 = memref.load %arg0[%6] : memref<8xi32, #tpu.memory_space<smem>>
    %8 = arith.index_cast %7 : i32 to index
    %9 = memref.load %arg1[%8] : memref<1001xf32, #tpu.memory_space<smem>>
    %10 = arith.index_cast %c1_i32 : i32 to index
    %11 = memref.load %arg2[%10] : memref<8xf32, #tpu.memory_space<smem>>
    memref.store %9, %arg2[%10] : memref<8xf32, #tpu.memory_space<smem>>
    %c2_i32 = arith.constant 2 : i32
    %12 = arith.index_cast %c2_i32 : i32 to index
    %13 = memref.load %arg0[%12] : memref<8xi32, #tpu.memory_space<smem>>
    %14 = arith.index_cast %13 : i32 to index
    %15 = memref.load %arg1[%14] : memref<1001xf32, #tpu.memory_space<smem>>
    %16 = arith.index_cast %c2_i32 : i32 to index
    %17 = memref.load %arg2[%16] : memref<8xf32, #tpu.memory_space<smem>>
    memref.store %15, %arg2[%16] : memref<8xf32, #tpu.memory_space<smem>>
    %c3_i32 = arith.constant 3 : i32
    %18 = arith.index_cast %c3_i32 : i32 to index
    %19 = memref.load %arg0[%18] : memref<8xi32, #tpu.memory_space<smem>>
    %20 = arith.index_cast %19 : i32 to index
    %21 = memref.load %arg1[%20] : memref<1001xf32, #tpu.memory_space<smem>>
    %22 = arith.index_cast %c3_i32 : i32 to index
    %23 = memref.load %arg2[%22] : memref<8xf32, #tpu.memory_space<smem>>
    memref.store %21, %arg2[%22] : memref<8xf32, #tpu.memory_space<smem>>
    %c4_i32 = arith.constant 4 : i32
    %24 = arith.index_cast %c4_i32 : i32 to index
    %25 = memref.load %arg0[%24] : memref<8xi32, #tpu.memory_space<smem>>
    %26 = arith.index_cast %25 : i32 to index
    %27 = memref.load %arg1[%26] : memref<1001xf32, #tpu.memory_space<smem>>
    %28 = arith.index_cast %c4_i32 : i32 to index
    %29 = memref.load %arg2[%28] : memref<8xf32, #tpu.memory_space<smem>>
    memref.store %27, %arg2[%28] : memref<8xf32, #tpu.memory_space<smem>>
    %c5_i32 = arith.constant 5 : i32
    %30 = arith.index_cast %c5_i32 : i32 to index
    %31 = memref.load %arg0[%30] : memref<8xi32, #tpu.memory_space<smem>>
    %32 = arith.index_cast %31 : i32 to index
    %33 = memref.load %arg1[%32] : memref<1001xf32, #tpu.memory_space<smem>>
    %34 = arith.index_cast %c5_i32 : i32 to index
    %35 = memref.load %arg2[%34] : memref<8xf32, #tpu.memory_space<smem>>
    memref.store %33, %arg2[%34] : memref<8xf32, #tpu.memory_space<smem>>
    %c6_i32 = arith.constant 6 : i32
    %36 = arith.index_cast %c6_i32 : i32 to index
    %37 = memref.load %arg0[%36] : memref<8xi32, #tpu.memory_space<smem>>
    %38 = arith.index_cast %37 : i32 to index
    %39 = memref.load %arg1[%38] : memref<1001xf32, #tpu.memory_space<smem>>
    %40 = arith.index_cast %c6_i32 : i32 to index
    %41 = memref.load %arg2[%40] : memref<8xf32, #tpu.memory_space<smem>>
    memref.store %39, %arg2[%40] : memref<8xf32, #tpu.memory_space<smem>>
    %c7_i32 = arith.constant 7 : i32
    %42 = arith.index_cast %c7_i32 : i32 to index
    %43 = memref.load %arg0[%42] : memref<8xi32, #tpu.memory_space<smem>>
    %44 = arith.index_cast %43 : i32 to index
    %45 = memref.load %arg1[%44] : memref<1001xf32, #tpu.memory_space<smem>>
    %46 = arith.index_cast %c7_i32 : i32 to index
    %47 = memref.load %arg2[%46] : memref<8xf32, #tpu.memory_space<smem>>
    memref.store %45, %arg2[%46] : memref<8xf32, #tpu.memory_space<smem>>
    %c8_i32 = arith.constant 8 : i32
    return
  }
}

</mosaic_0001>

<bundles_post_ra>
// kernel: tpu_custom_call.1
= control target key start
LH: loop header
LB: loop body
LE: loop exit
PB: predicated region body
PF: predicated region fallthrough
CT: control target
= control target key end

     0   :  { %7 = vsyncpa [#allocation3], 0  ;;  %s165_s0 = inlined_call_operand.hbm [shape: s32[8], index: 0, kind: input, shape index: {}]   ;;  %s166_s1 = inlined_call_operand.hbm [shape: f32[1001], index: 1, kind: input, shape index: {}]   ;;  %s167_s2 = inlined_call_operand.hbm [shape: f32[8], index: 2, kind: output, shape index: {}]  }
   0x1   :  { %8 = vsyncpa [#allocation6], 0 }
   0x2   :  { %9 = vsyncpa [#allocation4], 0  ;;  %s15_s11 = sshll.u32 %s165_s0, 4  ;;  %s24_s14 = sshll.u32 %s166_s1, 4  ;;  %s16_s11 = int_to_ptr.hbm [resolvable:$true] %s15_s11  ;;  %s25_s14 = int_to_ptr.hbm [resolvable:$true] %s24_s14 }
   0x3   :  { %s138_s15 = smov [#allocation2]   ;;  %s139_s16 = smov [#allocation5]  }
   0x4   :  { %18 = dma.hbm_to_smem %s16_s11, 16, %s138_s15, [#allocation3]  }
   0x5   :  { %27 = dma.hbm_to_smem %s25_s14, 128, %s139_s16, [#allocation6]  }
   0x6   :  { %132 = dma.done.wait [#allocation3], 16  }
   0x7   :  { %133 = vsyncadd [#allocation3], 4294967280 }
   0x8   :  { %134 = dma.done.wait [#allocation6], 128  }
   0x9   :  { %135 = vsyncadd [#allocation6], 4294967168 }
   0xa   :  { %36 = sfence }
   0xb   :  { %s37_s17 = sld [smem:[#allocation2]]  ;;  %s74_s5 = sshll.u32 %s167_s2, 4  ;;  %s75_s5 = int_to_ptr.hbm [resolvable:$true] %s74_s5 }
   0xc   :  { %s86_s18 = sld [smem:[#allocation2 + $0x1]]  ;;  %s140_s6 = smov [#allocation7]  }
   0xd   :  { %s87_s19 = sld [smem:[#allocation2 + $0x2]] }
   0xe   :  { %s88_s20 = sld [smem:[#allocation2 + $0x3]] }
   0xf   :  { %s89_s0 = sld [smem:[#allocation2 + $0x4]] }
  0x10   :  { %s90_s21 = sld [smem:[#allocation2 + $0x5]] }
  0x11   :  { %s38_s22 = sld [smem:[#allocation5 + %s37_s17]] }
  0x12   :  { %s42_s23 = sld [smem:[#allocation5 + %s86_s18]] }
  0x13   :  { %s46_s24 = sld [smem:[#allocation5 + %s87_s19]] }
  0x14   :  { %s50_s1 = sld [smem:[#allocation5 + %s88_s20]] }
  0x15   :  { %s54_s25 = sld [smem:[#allocation5 + %s89_s0]] }
  0x16   :  { %s58_s26 = sld [smem:[#allocation5 + %s90_s21]] }
  0x17   :  { %40 = sst [smem:[#allocation7]] %s38_s22 }
  0x18   :  { %44 = sst [smem:[#allocation7 + $0x1]] %s42_s23 }
  0x19   :  { %48 = sst [smem:[#allocation7 + $0x2]] %s46_s24 }
  0x1a   :  { %52 = sst [smem:[#allocation7 + $0x3]] %s50_s1 }
  0x1b   :  { %56 = sst [smem:[#allocation7 + $0x4]] %s54_s25 }
  0x1c   :  { %60 = sst [smem:[#allocation7 + $0x5]] %s58_s26 }
  0x1d   :  { %s91_s27 = sld [smem:[#allocation2 + $0x6]] }
  0x1e   :  { %s92_s28 = sld [smem:[#allocation2 + $0x7]] }
  0x23   :  { %s62_s29 = sld [smem:[#allocation5 + %s91_s27]] }
  0x24   :  { %s66_s30 = sld [smem:[#allocation5 + %s92_s28]] }
  0x29   :  { %64 = sst [smem:[#allocation7 + $0x6]] %s62_s29 }
  0x2a   :  { %68 = sst [smem:[#allocation7 + $0x7]] %s66_s30 }
  0x2b   :  { %77 = dma.smem_to_hbm %s140_s6, 16, %s75_s5, [#allocation4]  }
  0x2c   :  { %136 = dma.done.wait [#allocation4], 16  }
  0x2d   :  { %137 = vsyncadd [#allocation4], 4294967280 }
  0x2e   :  { %82 = sfence }
  0x2f   :  { %83 = vsyncpa [#allocation3], 1 }
  0x30   :  { %84 = vsyncpa [#allocation6], 1 }
  0x31   :  { %85 = vsyncpa [#allocation4], 1 }

</bundles_post_ra>
